<compile_context>
chip_gen: v7x
topology: tpu7x:2x2x1
jax: 0.10.0
libtpu: 0.0.40
codegen_flags: <defaults>
</compile_context>

<pallas_src>
import functools

import jax
import jax.numpy as jnp
import numpy as np
from jax import lax
from jax.experimental import pallas as pl
from jax.experimental.pallas import tpu as pltpu


# ---------------------------------------------------------------------------
# Kernels
# ---------------------------------------------------------------------------
def _shift_flat_kernel(x_ref, o_ref, *, plan, w, n):
    """Lane-dense path (odd kernels: output spatial size == input spatial size).

    x_ref / o_ref: VMEM (Bt, C, H*W) blocks.  `plan` is a static tuple of
    per-shift-group entries (c0, c1, oy0, oy1, ox0, ox1, off, full): channels
    [c0, c1) share the flat shift off = sy*W + sx and are non-zero only on the
    output window [oy0, oy1) x [ox0, ox1).  Per group: one pltpu.roll (XLU) +
    one jnp.where (VPU, border zeroing fused) + one lane-dense store (full
    H*W-wide last dim; also sublane-dense whenever the channel group >= 8).
    """
    # Hoisted once per grid step: flat-position iota and column index.
    pos = lax.broadcasted_iota(jnp.int32, (1, 1, n), 2)
    col = pos % w
    zero = jnp.zeros((), o_ref.dtype)

    for c0, c1, oy0, oy1, ox0, ox1, off, full in plan:
        if full:
            # Unshifted group covering the whole window: straight copy.
            o_ref[:, c0:c1, :] = x_ref[:, c0:c1, :]
            continue
        xg = x_ref[:, c0:c1, :]
        shift = (-off) % n
        shifted = pltpu.roll(xg, shift=shift, axis=2) if shift else xg
        # Row test done directly on the flat position (rows are contiguous).
        mask = ((pos >= oy0 * w) & (pos < oy1 * w) &
                (col >= ox0) & (col < ox1))
        o_ref[:, c0:c1, :] = jnp.where(mask, shifted, zero)


def _shift_slices_kernel(x_ref, o_ref, *, copy_plan, h_out, w_out):
    """General fallback (even kernel sizes: output grows), (Bt, C, H, W) layout.

    Static per-group slice copies with border-only zero fill (the previous
    version zeroed whole slabs and then overwrote them -> ~2x store traffic).
    """
    bt = o_ref.shape[0]
    for c0, c1, oy0, oy1, ox0, ox1, sy, sx in copy_plan:
        gsz = c1 - c0
        if oy1 <= oy0 or ox1 <= ox0:
            o_ref[:, c0:c1, :, :] = jnp.zeros((bt, gsz, h_out, w_out),
                                              o_ref.dtype)
            continue
        o_ref[:, c0:c1, oy0:oy1, ox0:ox1] = (
            x_ref[:, c0:c1, oy0 + sy:oy1 + sy, ox0 + sx:ox1 + sx])
        # Zero only the border strips around the valid window.
        if oy0 > 0:
            o_ref[:, c0:c1, 0:oy0, :] = jnp.zeros((bt, gsz, oy0, w_out),
                                                  o_ref.dtype)
        if oy1 < h_out:
            o_ref[:, c0:c1, oy1:h_out, :] = jnp.zeros(
                (bt, gsz, h_out - oy1, w_out), o_ref.dtype)
        if ox0 > 0:
            o_ref[:, c0:c1, oy0:oy1, 0:ox0] = jnp.zeros(
                (bt, gsz, oy1 - oy0, ox0), o_ref.dtype)
        if ox1 < w_out:
            o_ref[:, c0:c1, oy0:oy1, ox1:w_out] = jnp.zeros(
                (bt, gsz, oy1 - oy0, w_out - ox1), o_ref.dtype)


# ---------------------------------------------------------------------------
# Wrapper
# ---------------------------------------------------------------------------
def _physical_vmem_bytes():
    try:
        return int(pltpu.get_tpu_info().vmem_capacity_bytes)
    except Exception:
        return 64 * 2**20          # conservative default (v7x per-TC VMEM)


def _pick_batch_tile(b, per_batch_bytes, vmem_budget_bytes):
    """Fold batch elements so one grid step moves ~2 MiB when possible, while
    (a) fitting the double-buffered working set in the VMEM budget and
    (b) keeping >= 2 grid steps when B >= 2 (so both v7x cores get work)."""
    # Working set per step ~ 3x (in+out) block bytes: double-buffered I/O plus
    # in-kernel temporaries.
    cap = max(1, vmem_budget_bytes // max(1, 3 * per_batch_bytes))
    target = 2 * 2**20
    divisors = [d for d in range(1, b + 1) if b % d == 0 and d <= cap]
    preferred = [d for d in divisors if b // d >= 2] or divisors
    for d in preferred:
        if d * per_batch_bytes >= target:
            return d
    return preferred[-1]


def shift_pallas(x, kernel_size, dilation):
    if isinstance(kernel_size, int):
        kh, kw = kernel_size, kernel_size
    else:
        kh, kw = kernel_size
    b, c, h, w = x.shape
    kernel_elements = kh * kw
    assert c >= kernel_elements
    group_size = c // kernel_elements

    ph = (kh // 2) * dilation
    pw = (kw // 2) * dilation
    h_out = h + 2 * ph - (kh - 1) * dilation
    w_out = w + 2 * pw - (kw - 1) * dilation

    # ---- Static per-shift-group plan (compile-time constants). -------------
    # out[:, grp, oy, ox] = x[:, grp, oy + sy, ox + sx] if in-bounds else 0,
    # with sy = ky*dilation - ph, sx = kx*dilation - pw.
    groups = []

    def add_group(c0, c1, ky, kx):
        sy = ky * dilation - ph
        sx = kx * dilation - pw
        oy0 = max(0, -sy)
        oy1 = min(h_out, h - sy)
        ox0 = max(0, -sx)
        ox1 = min(w_out, w - sx)
        groups.append((c0, c1, oy0, oy1, ox0, ox1, sy, sx))

    for g in range(kernel_elements):
        add_group(g * group_size, (g + 1) * group_size, g // kw, g % kw)
    if kernel_elements * group_size < c:
        # Leftover channels use the (ky=0, kx=0) window, as in the PyTorch code.
        add_group(kernel_elements * group_size, c, 0, 0)

    # ---- Tiling / VMEM budgeting. -------------------------------------------
    itemsize = jnp.dtype(x.dtype).itemsize
    per_batch_bytes = (c * h * w + c * h_out * w_out) * itemsize
    phys_vmem = _physical_vmem_bytes()
    vmem_budget = min(int(phys_vmem * 0.55), 96 * 2**20)
    bt = _pick_batch_tile(b, per_batch_bytes, vmem_budget)
    per_step_bytes = bt * per_batch_bytes
    # Real double-buffered requirement + headroom, not a blind 32 MiB clamp.
    vmem_limit = int(min(phys_vmem * 0.9,
                         max(32 * 2**20, 3 * per_step_bytes + 8 * 2**20)))
    # TODO(synk): if a single batch element's block exceeds the VMEM budget
    # (very large C*H*W), add a second grid axis splitting H (or the channel
    # groups) so v7x's 64 MiB VMEM still double-buffers.
    compiler_params = pltpu.CompilerParams(
        dimension_semantics=("parallel",),
        vmem_limit_bytes=vmem_limit)
    cost = pl.CostEstimate(flops=0, transcendentals=0,
                           bytes_accessed=int(b * per_batch_bytes))
    grid = (b // bt,)

    if h_out == h and w_out == w:
        # Odd kernel sizes: lane-dense flat (B, C, H*W) roll + mask path.
        n = h * w
        flat_plan = tuple(
            (c0, c1, oy0, oy1, ox0, ox1, sy * w + sx,
             oy0 == 0 and oy1 == h and ox0 == 0 and ox1 == w)
            for (c0, c1, oy0, oy1, ox0, ox1, sy, sx) in groups)
        kernel = functools.partial(_shift_flat_kernel, plan=flat_plan, w=w, n=n)
        out_flat = pl.pallas_call(
            kernel,
            out_shape=jax.ShapeDtypeStruct((b, c, n), x.dtype),
            grid=grid,
            in_specs=[pl.BlockSpec((bt, c, n), lambda i: (i, 0, 0))],
            out_specs=pl.BlockSpec((bt, c, n), lambda i: (i, 0, 0)),
            compiler_params=compiler_params,
            cost_estimate=cost,
        )(x.reshape(b, c, n))
        return out_flat.reshape(b, c, h_out, w_out)

    # Even kernel sizes (output grows): static slice-copy plan in 4-D layout.
    kernel = functools.partial(_shift_slices_kernel, copy_plan=tuple(groups),
                               h_out=h_out, w_out=w_out)
    return pl.pallas_call(
        kernel,
        out_shape=jax.ShapeDtypeStruct((b, c, h_out, w_out), x.dtype),
        grid=grid,
        in_specs=[pl.BlockSpec((bt, c, h, w), lambda i: (i, 0, 0, 0))],
        out_specs=pl.BlockSpec((bt, c, h_out, w_out), lambda i: (i, 0, 0, 0)),
        compiler_params=compiler_params,
        cost_estimate=cost,
    )(x)


# ---------------------------------------------------------------------------
# Reference (pure numpy transcription of the PyTorch forward)
# ---------------------------------------------------------------------------
def shift_reference(x, kernel_size, dilation):
    x = np.asarray(x)
    kh, kw = kernel_size
    b, c, h, w = x.shape
    kernel_elements = kh * kw
    group_size = c // kernel_elements
    ph = (kh // 2) * dilation
    pw = (kw // 2) * dilation
    xp = np.pad(x, ((0, 0), (0, 0), (ph, ph), (pw, pw)))
    hp, wp = xp.shape[2], xp.shape[3]

    def window(data, kx, ky):
        ys = ky * dilation
        ye = hp - (kh - ky - 1) * dilation
        xs = kx * dilation
        xe = wp - (kw - kx - 1) * dilation
        return data[:, :, ys:ye, xs:xe]

    shifted = []
    g = 0
    for ky in range(kh):
        for kx in range(kw):
            cs = g * group_size
            shifted.append(window(xp[:, cs:cs + group_size], kx, ky))
            g += 1
    if g * group_size < c:
        shifted.append(window(xp[:, g * group_size:], 0, 0))
    return np.concatenate(shifted, axis=1)


if __name__ == "__main__":
    key = jax.random.PRNGKey(0)
    cases = [
        ((2, 16, 16, 16), (3, 3), 1),   # odd kernel -> lane-dense flat path
        ((2, 16, 16, 16), (3, 3), 2),   # dilation 2
        ((2, 16, 8, 16), (3, 3), 1),    # non-square spatial
        ((2, 16, 16, 16), (2, 2), 1),   # even kernel -> slice-copy fallback
    ]
    for shape, ks, dil in cases:
        key, sub = jax.random.split(key)
        x = jax.random.normal(sub, shape, dtype=jnp.float32)
        out = jax.block_until_ready(shift_pallas(x, ks, dil))
        ref = shift_reference(np.asarray(x), ks, dil)
        assert out.shape == ref.shape, (out.shape, ref.shape)
        np.testing.assert_allclose(np.asarray(out), ref, rtol=0, atol=0)
    print("KERNEL_OK")
</pallas_src>

<mosaic_0001>
module attributes {stable_mosaic.version = 11 : i64} {
  func.func @_shift_flat_kernel(%arg0: i32, %arg1: memref<1x16x256xf32, #tpu.memory_space<vmem>>, %arg2: memref<1x16x256xf32, #tpu.memory_space<vmem>>) attributes {dimension_semantics = [#tpu.dimension_semantics<parallel>], iteration_bounds = array<i64: 2>, scalar_prefetch = 0 : i64, scratch_operands = 0 : i64, tpu.core_type = #tpu.core_type<tc>, window_params = [{transform_indices = @transform_0, window_bounds = array<i64: 1, 16, 256>}, {transform_indices = @transform_1, window_bounds = array<i64: 1, 16, 256>}]} {
    %0 = tpu.iota {dimensions = array<i32: 2>} : vector<1x1x256xi32>
    %c16_i32 = arith.constant 16 : i32
    %c0_i32 = arith.constant 0 : i32
    %1 = arith.cmpi eq, %c16_i32, %c0_i32 : i32
    %c1_i32 = arith.constant 1 : i32
    %2 = arith.select %1, %c1_i32, %c16_i32 : i32
    %3 = vector.broadcast %2 : i32 to vector<1x1x256xi32>
    %4 = arith.remsi %0, %3 : vector<1x1x256xi32>
    %c0_i32_0 = arith.constant 0 : i32
    %5 = vector.broadcast %c0_i32_0 : i32 to vector<1x1x256xi32>
    %6 = arith.cmpi ne, %4, %5 : vector<1x1x256xi32>
    %c0_i32_1 = arith.constant 0 : i32
    %7 = vector.broadcast %c0_i32_1 : i32 to vector<1x1x256xi32>
    %8 = arith.cmpi slt, %4, %7 : vector<1x1x256xi32>
    %c0_i32_2 = arith.constant 0 : i32
    %9 = arith.cmpi slt, %2, %c0_i32_2 : i32
    %10 = vector.broadcast %9 : i1 to vector<1x1x256xi1>
    %11 = vector.broadcast %10 : vector<1x1x256xi1> to vector<1x1x256xi1>
    %12 = arith.xori %8, %11 : vector<1x1x256xi1>
    %13 = arith.andi %12, %6 : vector<1x1x256xi1>
    %14 = vector.broadcast %2 : i32 to vector<1x1x256xi32>
    %15 = arith.addi %4, %14 : vector<1x1x256xi32>
    %16 = arith.select %13, %15, %4 : vector<1x1x256xi1>, vector<1x1x256xi32>
    %c0 = arith.constant 0 : index
    %c0_3 = arith.constant 0 : index
    %c0_4 = arith.constant 0 : index
    %17 = vector.load %arg1[%c0, %c0_3, %c0_4] : memref<1x16x256xf32, #tpu.memory_space<vmem>>, vector<1x1x256xf32>
    %c17_i32 = arith.constant 17 : i32
    %18 = tpu.dynamic_rotate %17 by %c17_i32 dim 2 : vector<1x1x256xf32>, i32 -> vector<1x1x256xf32>
    %c16_i32_5 = arith.constant 16 : i32
    %19 = vector.broadcast %c16_i32_5 : i32 to vector<1x1x256xi32>
    %20 = arith.cmpi sge, %0, %19 : vector<1x1x256xi32>
    %c256_i32 = arith.constant 256 : i32
    %21 = vector.broadcast %c256_i32 : i32 to vector<1x1x256xi32>
    %22 = arith.cmpi slt, %0, %21 : vector<1x1x256xi32>
    %23 = arith.andi %20, %22 : vector<1x1x256xi1>
    %c1_i32_6 = arith.constant 1 : i32
    %24 = vector.broadcast %c1_i32_6 : i32 to vector<1x1x256xi32>
    %25 = arith.cmpi sge, %16, %24 : vector<1x1x256xi32>
    %26 = arith.andi %23, %25 : vector<1x1x256xi1>
    %c16_i32_7 = arith.constant 16 : i32
    %27 = vector.broadcast %c16_i32_7 : i32 to vector<1x1x256xi32>
    %28 = arith.cmpi slt, %16, %27 : vector<1x1x256xi32>
    %29 = arith.andi %26, %28 : vector<1x1x256xi1>
    %cst = arith.constant 0.000000e+00 : f32
    %30 = vector.broadcast %cst : f32 to vector<1x1x256xf32>
    %31 = arith.select %29, %18, %30 : vector<1x1x256xi1>, vector<1x1x256xf32>
    %c0_8 = arith.constant 0 : index
    %c0_9 = arith.constant 0 : index
    %c0_10 = arith.constant 0 : index
    %32 = vector.load %arg2[%c0_8, %c0_9, %c0_10] : memref<1x16x256xf32, #tpu.memory_space<vmem>>, vector<1x1x256xf32>
    tpu.vector_store %arg2[%c0_8, %c0_9, %c0_10], %31 {strides = array<i32>} : memref<1x16x256xf32, #tpu.memory_space<vmem>>, vector<1x1x256xf32>,
    %c0_11 = arith.constant 0 : index
    %c1 = arith.constant 1 : index
    %c0_12 = arith.constant 0 : index
    %33 = vector.load %arg1[%c0_11, %c1, %c0_12] : memref<1x16x256xf32, #tpu.memory_space<vmem>>, vector<1x1x256xf32>
    %c16_i32_13 = arith.constant 16 : i32
    %34 = tpu.dynamic_rotate %33 by %c16_i32_13 dim 2 : vector<1x1x256xf32>, i32 -> vector<1x1x256xf32>
    %c16_i32_14 = arith.constant 16 : i32
    %35 = vector.broadcast %c16_i32_14 : i32 to vector<1x1x256xi32>
    %36 = arith.cmpi sge, %0, %35 : vector<1x1x256xi32>
    %c256_i32_15 = arith.constant 256 : i32
    %37 = vector.broadcast %c256_i32_15 : i32 to vector<1x1x256xi32>
    %38 = arith.cmpi slt, %0, %37 : vector<1x1x256xi32>
    %39 = arith.andi %36, %38 : vector<1x1x256xi1>
    %c0_i32_16 = arith.constant 0 : i32
    %40 = vector.broadcast %c0_i32_16 : i32 to vector<1x1x256xi32>
    %41 = arith.cmpi sge, %16, %40 : vector<1x1x256xi32>
    %42 = arith.andi %39, %41 : vector<1x1x256xi1>
    %c16_i32_17 = arith.constant 16 : i32
    %43 = vector.broadcast %c16_i32_17 : i32 to vector<1x1x256xi32>
    %44 = arith.cmpi slt, %16, %43 : vector<1x1x256xi32>
    %45 = arith.andi %42, %44 : vector<1x1x256xi1>
    %cst_18 = arith.constant 0.000000e+00 : f32
    %46 = vector.broadcast %cst_18 : f32 to vector<1x1x256xf32>
    %47 = arith.select %45, %34, %46 : vector<1x1x256xi1>, vector<1x1x256xf32>
    %c0_19 = arith.constant 0 : index
    %c1_20 = arith.constant 1 : index
    %c0_21 = arith.constant 0 : index
    %48 = vector.load %arg2[%c0_19, %c1_20, %c0_21] : memref<1x16x256xf32, #tpu.memory_space<vmem>>, vector<1x1x256xf32>
    tpu.vector_store %arg2[%c0_19, %c1_20, %c0_21], %47 {strides = array<i32>} : memref<1x16x256xf32, #tpu.memory_space<vmem>>, vector<1x1x256xf32>,
    %c0_22 = arith.constant 0 : index
    %c2 = arith.constant 2 : index
    %c0_23 = arith.constant 0 : index
    %49 = vector.load %arg1[%c0_22, %c2, %c0_23] : memref<1x16x256xf32, #tpu.memory_space<vmem>>, vector<1x1x256xf32>
    %c15_i32 = arith.constant 15 : i32
    %50 = tpu.dynamic_rotate %49 by %c15_i32 dim 2 : vector<1x1x256xf32>, i32 -> vector<1x1x256xf32>
    %c16_i32_24 = arith.constant 16 : i32
    %51 = vector.broadcast %c16_i32_24 : i32 to vector<1x1x256xi32>
    %52 = arith.cmpi sge, %0, %51 : vector<1x1x256xi32>
    %c256_i32_25 = arith.constant 256 : i32
    %53 = vector.broadcast %c256_i32_25 : i32 to vector<1x1x256xi32>
    %54 = arith.cmpi slt, %0, %53 : vector<1x1x256xi32>
    %55 = arith.andi %52, %54 : vector<1x1x256xi1>
    %c0_i32_26 = arith.constant 0 : i32
    %56 = vector.broadcast %c0_i32_26 : i32 to vector<1x1x256xi32>
    %57 = arith.cmpi sge, %16, %56 : vector<1x1x256xi32>
    %58 = arith.andi %55, %57 : vector<1x1x256xi1>
    %c15_i32_27 = arith.constant 15 : i32
    %59 = vector.broadcast %c15_i32_27 : i32 to vector<1x1x256xi32>
    %60 = arith.cmpi slt, %16, %59 : vector<1x1x256xi32>
    %61 = arith.andi %58, %60 : vector<1x1x256xi1>
    %cst_28 = arith.constant 0.000000e+00 : f32
    %62 = vector.broadcast %cst_28 : f32 to vector<1x1x256xf32>
    %63 = arith.select %61, %50, %62 : vector<1x1x256xi1>, vector<1x1x256xf32>
    %c0_29 = arith.constant 0 : index
    %c2_30 = arith.constant 2 : index
    %c0_31 = arith.constant 0 : index
    %64 = vector.load %arg2[%c0_29, %c2_30, %c0_31] : memref<1x16x256xf32, #tpu.memory_space<vmem>>, vector<1x1x256xf32>
    tpu.vector_store %arg2[%c0_29, %c2_30, %c0_31], %63 {strides = array<i32>} : memref<1x16x256xf32, #tpu.memory_space<vmem>>, vector<1x1x256xf32>,
    %c0_32 = arith.constant 0 : index
    %c3 = arith.constant 3 : index
    %c0_33 = arith.constant 0 : index
    %65 = vector.load %arg1[%c0_32, %c3, %c0_33] : memref<1x16x256xf32, #tpu.memory_space<vmem>>, vector<1x1x256xf32>
    %c1_i32_34 = arith.constant 1 : i32
    %66 = tpu.dynamic_rotate %65 by %c1_i32_34 dim 2 : vector<1x1x256xf32>, i32 -> vector<1x1x256xf32>
    %c0_i32_35 = arith.constant 0 : i32
    %67 = vector.broadcast %c0_i32_35 : i32 to vector<1x1x256xi32>
    %68 = arith.cmpi sge, %0, %67 : vector<1x1x256xi32>
    %c256_i32_36 = arith.constant 256 : i32
    %69 = vector.broadcast %c256_i32_36 : i32 to vector<1x1x256xi32>
    %70 = arith.cmpi slt, %0, %69 : vector<1x1x256xi32>
    %71 = arith.andi %68, %70 : vector<1x1x256xi1>
    %c1_i32_37 = arith.constant 1 : i32
    %72 = vector.broadcast %c1_i32_37 : i32 to vector<1x1x256xi32>
    %73 = arith.cmpi sge, %16, %72 : vector<1x1x256xi32>
    %74 = arith.andi %71, %73 : vector<1x1x256xi1>
    %c16_i32_38 = arith.constant 16 : i32
    %75 = vector.broadcast %c16_i32_38 : i32 to vector<1x1x256xi32>
    %76 = arith.cmpi slt, %16, %75 : vector<1x1x256xi32>
    %77 = arith.andi %74, %76 : vector<1x1x256xi1>
    %cst_39 = arith.constant 0.000000e+00 : f32
    %78 = vector.broadcast %cst_39 : f32 to vector<1x1x256xf32>
    %79 = arith.select %77, %66, %78 : vector<1x1x256xi1>, vector<1x1x256xf32>
    %c0_40 = arith.constant 0 : index
    %c3_41 = arith.constant 3 : index
    %c0_42 = arith.constant 0 : index
    %80 = vector.load %arg2[%c0_40, %c3_41, %c0_42] : memref<1x16x256xf32, #tpu.memory_space<vmem>>, vector<1x1x256xf32>
    tpu.vector_store %arg2[%c0_40, %c3_41, %c0_42], %79 {strides = array<i32>} : memref<1x16x256xf32, #tpu.memory_space<vmem>>, vector<1x1x256xf32>,
    %c0_43 = arith.constant 0 : index
    %c4 = arith.constant 4 : index
    %c0_44 = arith.constant 0 : index
    %81 = vector.load %arg1[%c0_43, %c4, %c0_44] : memref<1x16x256xf32, #tpu.memory_space<vmem>>, vector<1x1x256xf32>
    %c0_45 = arith.constant 0 : index
    %c4_46 = arith.constant 4 : index
    %c0_47 = arith.constant 0 : index
    %82 = vector.load %arg2[%c0_45, %c4_46, %c0_47] : memref<1x16x256xf32, #tpu.memory_space<vmem>>, vector<1x1x256xf32>
    tpu.vector_store %arg2[%c0_45, %c4_46, %c0_47], %81 {strides = array<i32>} : memref<1x16x256xf32, #tpu.memory_space<vmem>>, vector<1x1x256xf32>,
    %c0_48 = arith.constant 0 : index
    %c5 = arith.constant 5 : index
    %c0_49 = arith.constant 0 : index
    %83 = vector.load %arg1[%c0_48, %c5, %c0_49] : memref<1x16x256xf32, #tpu.memory_space<vmem>>, vector<1x1x256xf32>
    %c255_i32 = arith.constant 255 : i32
    %84 = tpu.dynamic_rotate %83 by %c255_i32 dim 2 : vector<1x1x256xf32>, i32 -> vector<1x1x256xf32>
    %c0_i32_50 = arith.constant 0 : i32
    %85 = vector.broadcast %c0_i32_50 : i32 to vector<1x1x256xi32>
    %86 = arith.cmpi sge, %0, %85 : vector<1x1x256xi32>
    %c256_i32_51 = arith.constant 256 : i32
    %87 = vector.broadcast %c256_i32_51 : i32 to vector<1x1x256xi32>
    %88 = arith.cmpi slt, %0, %87 : vector<1x1x256xi32>
    %89 = arith.andi %86, %88 : vector<1x1x256xi1>
    %c0_i32_52 = arith.constant 0 : i32
    %90 = vector.broadcast %c0_i32_52 : i32 to vector<1x1x256xi32>
    %91 = arith.cmpi sge, %16, %90 : vector<1x1x256xi32>
    %92 = arith.andi %89, %91 : vector<1x1x256xi1>
    %c15_i32_53 = arith.constant 15 : i32
    %93 = vector.broadcast %c15_i32_53 : i32 to vector<1x1x256xi32>
    %94 = arith.cmpi slt, %16, %93 : vector<1x1x256xi32>
    %95 = arith.andi %92, %94 : vector<1x1x256xi1>
    %cst_54 = arith.constant 0.000000e+00 : f32
    %96 = vector.broadcast %cst_54 : f32 to vector<1x1x256xf32>
    %97 = arith.select %95, %84, %96 : vector<1x1x256xi1>, vector<1x1x256xf32>
    %c0_55 = arith.constant 0 : index
    %c5_56 = arith.constant 5 : index
    %c0_57 = arith.constant 0 : index
    %98 = vector.load %arg2[%c0_55, %c5_56, %c0_57] : memref<1x16x256xf32, #tpu.memory_space<vmem>>, vector<1x1x256xf32>
    tpu.vector_store %arg2[%c0_55, %c5_56, %c0_57], %97 {strides = array<i32>} : memref<1x16x256xf32, #tpu.memory_space<vmem>>, vector<1x1x256xf32>,
    %c0_58 = arith.constant 0 : index
    %c6 = arith.constant 6 : index
    %c0_59 = arith.constant 0 : index
    %99 = vector.load %arg1[%c0_58, %c6, %c0_59] : memref<1x16x256xf32, #tpu.memory_space<vmem>>, vector<1x1x256xf32>
    %c241_i32 = arith.constant 241 : i32
    %100 = tpu.dynamic_rotate %99 by %c241_i32 dim 2 : vector<1x1x256xf32>, i32 -> vector<1x1x256xf32>
    %c0_i32_60 = arith.constant 0 : i32
    %101 = vector.broadcast %c0_i32_60 : i32 to vector<1x1x256xi32>
    %102 = arith.cmpi sge, %0, %101 : vector<1x1x256xi32>
    %c240_i32 = arith.constant 240 : i32
    %103 = vector.broadcast %c240_i32 : i32 to vector<1x1x256xi32>
    %104 = arith.cmpi slt, %0, %103 : vector<1x1x256xi32>
    %105 = arith.andi %102, %104 : vector<1x1x256xi1>
    %c1_i32_61 = arith.constant 1 : i32
    %106 = vector.broadcast %c1_i32_61 : i32 to vector<1x1x256xi32>
    %107 = arith.cmpi sge, %16, %106 : vector<1x1x256xi32>
    %108 = arith.andi %105, %107 : vector<1x1x256xi1>
    %c16_i32_62 = arith.constant 16 : i32
    %109 = vector.broadcast %c16_i32_62 : i32 to vector<1x1x256xi32>
    %110 = arith.cmpi slt, %16, %109 : vector<1x1x256xi32>
    %111 = arith.andi %108, %110 : vector<1x1x256xi1>
    %cst_63 = arith.constant 0.000000e+00 : f32
    %112 = vector.broadcast %cst_63 : f32 to vector<1x1x256xf32>
    %113 = arith.select %111, %100, %112 : vector<1x1x256xi1>, vector<1x1x256xf32>
    %c0_64 = arith.constant 0 : index
    %c6_65 = arith.constant 6 : index
    %c0_66 = arith.constant 0 : index
    %114 = vector.load %arg2[%c0_64, %c6_65, %c0_66] : memref<1x16x256xf32, #tpu.memory_space<vmem>>, vector<1x1x256xf32>
    tpu.vector_store %arg2[%c0_64, %c6_65, %c0_66], %113 {strides = array<i32>} : memref<1x16x256xf32, #tpu.memory_space<vmem>>, vector<1x1x256xf32>,
    %c0_67 = arith.constant 0 : index
    %c7 = arith.constant 7 : index
    %c0_68 = arith.constant 0 : index
    %115 = vector.load %arg1[%c0_67, %c7, %c0_68] : memref<1x16x256xf32, #tpu.memory_space<vmem>>, vector<1x1x256xf32>
    %c240_i32_69 = arith.constant 240 : i32
    %116 = tpu.dynamic_rotate %115 by %c240_i32_69 dim 2 : vector<1x1x256xf32>, i32 -> vector<1x1x256xf32>
    %c0_i32_70 = arith.constant 0 : i32
    %117 = vector.broadcast %c0_i32_70 : i32 to vector<1x1x256xi32>
    %118 = arith.cmpi sge, %0, %117 : vector<1x1x256xi32>
    %c240_i32_71 = arith.constant 240 : i32
    %119 = vector.broadcast %c240_i32_71 : i32 to vector<1x1x256xi32>
    %120 = arith.cmpi slt, %0, %119 : vector<1x1x256xi32>
    %121 = arith.andi %118, %120 : vector<1x1x256xi1>
    %c0_i32_72 = arith.constant 0 : i32
    %122 = vector.broadcast %c0_i32_72 : i32 to vector<1x1x256xi32>
    %123 = arith.cmpi sge, %16, %122 : vector<1x1x256xi32>
    %124 = arith.andi %121, %123 : vector<1x1x256xi1>
    %c16_i32_73 = arith.constant 16 : i32
    %125 = vector.broadcast %c16_i32_73 : i32 to vector<1x1x256xi32>
    %126 = arith.cmpi slt, %16, %125 : vector<1x1x256xi32>
    %127 = arith.andi %124, %126 : vector<1x1x256xi1>
    %cst_74 = arith.constant 0.000000e+00 : f32
    %128 = vector.broadcast %cst_74 : f32 to vector<1x1x256xf32>
    %129 = arith.select %127, %116, %128 : vector<1x1x256xi1>, vector<1x1x256xf32>
    %c0_75 = arith.constant 0 : index
    %c7_76 = arith.constant 7 : index
    %c0_77 = arith.constant 0 : index
    %130 = vector.load %arg2[%c0_75, %c7_76, %c0_77] : memref<1x16x256xf32, #tpu.memory_space<vmem>>, vector<1x1x256xf32>
    tpu.vector_store %arg2[%c0_75, %c7_76, %c0_77], %129 {strides = array<i32>} : memref<1x16x256xf32, #tpu.memory_space<vmem>>, vector<1x1x256xf32>,
    %c0_78 = arith.constant 0 : index
    %c8 = arith.constant 8 : index
    %c0_79 = arith.constant 0 : index
    %131 = vector.load %arg1[%c0_78, %c8, %c0_79] : memref<1x16x256xf32, #tpu.memory_space<vmem>>, vector<1x1x256xf32>
    %c239_i32 = arith.constant 239 : i32
    %132 = tpu.dynamic_rotate %131 by %c239_i32 dim 2 : vector<1x1x256xf32>, i32 -> vector<1x1x256xf32>
    %c0_i32_80 = arith.constant 0 : i32
    %133 = vector.broadcast %c0_i32_80 : i32 to vector<1x1x256xi32>
    %134 = arith.cmpi sge, %0, %133 : vector<1x1x256xi32>
    %c240_i32_81 = arith.constant 240 : i32
    %135 = vector.broadcast %c240_i32_81 : i32 to vector<1x1x256xi32>
    %136 = arith.cmpi slt, %0, %135 : vector<1x1x256xi32>
    %137 = arith.andi %134, %136 : vector<1x1x256xi1>
    %c0_i32_82 = arith.constant 0 : i32
    %138 = vector.broadcast %c0_i32_82 : i32 to vector<1x1x256xi32>
    %139 = arith.cmpi sge, %16, %138 : vector<1x1x256xi32>
    %140 = arith.andi %137, %139 : vector<1x1x256xi1>
    %c15_i32_83 = arith.constant 15 : i32
    %141 = vector.broadcast %c15_i32_83 : i32 to vector<1x1x256xi32>
    %142 = arith.cmpi slt, %16, %141 : vector<1x1x256xi32>
    %143 = arith.andi %140, %142 : vector<1x1x256xi1>
    %cst_84 = arith.constant 0.000000e+00 : f32
    %144 = vector.broadcast %cst_84 : f32 to vector<1x1x256xf32>
    %145 = arith.select %143, %132, %144 : vector<1x1x256xi1>, vector<1x1x256xf32>
    %c0_85 = arith.constant 0 : index
    %c8_86 = arith.constant 8 : index
    %c0_87 = arith.constant 0 : index
    %146 = vector.load %arg2[%c0_85, %c8_86, %c0_87] : memref<1x16x256xf32, #tpu.memory_space<vmem>>, vector<1x1x256xf32>
    tpu.vector_store %arg2[%c0_85, %c8_86, %c0_87], %145 {strides = array<i32>} : memref<1x16x256xf32, #tpu.memory_space<vmem>>, vector<1x1x256xf32>,
    %c0_88 = arith.constant 0 : index
    %c9 = arith.constant 9 : index
    %c0_89 = arith.constant 0 : index
    %147 = vector.load %arg1[%c0_88, %c9, %c0_89] : memref<1x16x256xf32, #tpu.memory_space<vmem>>, vector<1x7x256xf32>
    %c17_i32_90 = arith.constant 17 : i32
    %148 = tpu.dynamic_rotate %147 by %c17_i32_90 dim 2 : vector<1x7x256xf32>, i32 -> vector<1x7x256xf32>
    %c16_i32_91 = arith.constant 16 : i32
    %149 = vector.broadcast %c16_i32_91 : i32 to vector<1x1x256xi32>
    %150 = arith.cmpi sge, %0, %149 : vector<1x1x256xi32>
    %c256_i32_92 = arith.constant 256 : i32
    %151 = vector.broadcast %c256_i32_92 : i32 to vector<1x1x256xi32>
    %152 = arith.cmpi slt, %0, %151 : vector<1x1x256xi32>
    %153 = arith.andi %150, %152 : vector<1x1x256xi1>
    %c1_i32_93 = arith.constant 1 : i32
    %154 = vector.broadcast %c1_i32_93 : i32 to vector<1x1x256xi32>
    %155 = arith.cmpi sge, %16, %154 : vector<1x1x256xi32>
    %156 = arith.andi %153, %155 : vector<1x1x256xi1>
    %c16_i32_94 = arith.constant 16 : i32
    %157 = vector.broadcast %c16_i32_94 : i32 to vector<1x1x256xi32>
    %158 = arith.cmpi slt, %16, %157 : vector<1x1x256xi32>
    %159 = arith.andi %156, %158 : vector<1x1x256xi1>
    %cst_95 = arith.constant 0.000000e+00 : f32
    %160 = vector.shape_cast %159 : vector<1x1x256xi1> to vector<1x1x256xi1>
    %161 = vector.broadcast %160 : vector<1x1x256xi1> to vector<1x7x256xi1>
    %162 = vector.broadcast %cst_95 : f32 to vector<1x7x256xf32>
    %163 = arith.select %161, %148, %162 : vector<1x7x256xi1>, vector<1x7x256xf32>
    %c0_96 = arith.constant 0 : index
    %c9_97 = arith.constant 9 : index
    %c0_98 = arith.constant 0 : index
    %164 = vector.load %arg2[%c0_96, %c9_97, %c0_98] : memref<1x16x256xf32, #tpu.memory_space<vmem>>, vector<1x7x256xf32>
    tpu.vector_store %arg2[%c0_96, %c9_97, %c0_98], %163 {strides = array<i32>} : memref<1x16x256xf32, #tpu.memory_space<vmem>>, vector<1x7x256xf32>,
    return
  }
  func.func @transform_0(%arg0: i32) -> (i32, i32, i32) {
    %c0_i32 = arith.constant 0 : i32
    %c0_i32_0 = arith.constant 0 : i32
    %c0_i32_1 = arith.constant 0 : i32
    return %arg0, %c0_i32, %c0_i32_0 : i32, i32, i32
  }
  func.func @transform_1(%arg0: i32) -> (i32, i32, i32) {
    %c0_i32 = arith.constant 0 : i32
    %c0_i32_0 = arith.constant 0 : i32
    %c0_i32_1 = arith.constant 0 : i32
    return %arg0, %c0_i32, %c0_i32_0 : i32, i32, i32
  }
}

</mosaic_0001>

<bundles_post_ra>
// kernel: tpu_custom_call.1
= control target key start
LH: loop header
LB: loop body
LE: loop exit
PB: predicated region body
PF: predicated region fallthrough
CT: control target
= control target key end

     0   :  { %6 = vsyncpa [#allocation3], 0  ;;  %s1218_s0 = inlined_call_operand.hbm [shape: f32[2,16,256], index: 0, kind: input, shape index: {}]   ;;  %s1219_s1 = inlined_call_operand.hbm [shape: f32[2,16,256], index: 1, kind: output, shape index: {}]  }
   0x1   :  { %8 = vsyncpa [#allocation3 + $0x1], 0 }
   0x2   :  { %9 = vsyncpa [#allocation4], 0 }
   0x3   :  { %11 = vsyncpa [#allocation4 + $0x1], 0  ;;  %s890_s6 = smov 0   ;;  %s892_s7 = smov 0  }
   0x4   :  { %s894_s8 = smov 0   ;;  %s896_s9 = smov 0  }
   0x5 LB: > { %s911_s10 = sadd.s32 4294967295, %s864_s9   ;;  %s678_s11 = sadd.s32 4294967294, %s864_s9   ;;  %s864_s9 = sphi %s896_s9, %s1244_s9   ;;  %s860_s8 = sphi %s894_s8, %s1243_s8   ;;  %s856_s7 = sphi %s892_s7, %s1242_s7   ;;  %s852_s6 = sphi %s890_s6, %s1241_s6  }
   0x6   : > { %s915_s12 = sadd.s32 1, %s864_s9   ;;  %s24_s13 = sadd.s32 1, %s860_s8 }
   0x7   : > { %s21_s14 = ssub.s32 %s864_s9, %s915_s12  ;;  %p31_p0 = scmp.ne.s32.totalorder %s860_s8, %s856_s7 }
   0x8   : > { %p22_p1 = scmp.eq.s32.totalorder %s21_s14, 0  ;;  %p32_p2 = scmp.eq.s32.totalorder %s864_s9, 0 }
   0x9   : > { %p37_p3 = scmp.ne.s32.totalorder %s856_s7, %s852_s6  ;;  %p38_p4 = scmp.eq.s32.totalorder %s911_s10, 0 }
   0xa   : > { %s927_s15 = scalar_select %p22_p1, %s860_s8, %s24_s13  }
   0xb   : > { %p929_p5 = por %p32_p2, %p31_p0  ;;  %p933_p6 = por %p38_p4, %p37_p3 }
   0xc   : > { %p61_p7 = scmp.eq.s32.totalorder %s911_s10, 1  ;;  %p67_p8 = scmp.eq.s32.totalorder %s678_s11, 1 }
   0xd   : > { %p722_p10 = scmp.lt.s32.totalorder %s864_s9, 2  ;;  %s87_s20 = sand.u32 1, %s860_s8  }
   0xe   : > { %p940_p11 = por %p61_p7, %p31_p0  ;;  %p944_p12 = por %p67_p8, %p37_p3 }
   0xf   : > { %s708_s21 = sshll.u32 %s864_s9, 9  ;;  %s681_s22 = sshll.u32 %s87_s20, 5 }
  0x10   : > { %s1223_s18 = scalar_select %p940_p11, 1, 0 }
  0x11   : > { %s1224_s19 = scalar_select %p944_p12, 1, 0 }
  0x12   : > { %s953_s25 = scalar_lea.hbm %s1218_s0, %s708_s21  ;;  %s91_s26 = scalar_lea.vmem [#allocation2], %s681_s22 }
  0x13   : > { %s98_s27 = sshll.u32 %s91_s26, 4  ;;  %p957_p13 = pnand %p722_p10, %p929_p5  ;;  %s961_s27 = int_to_ptr.vmem [resolvable:$true] %s98_s27 }
  0x14   : > { %s963_s29 = scalar_lea.sflag [#allocation3], %s87_s20  ;;  %s768_s30 = scalar_lea.hbm %s953_s25, 512 }
  0x15   : > { %p769_p0 = scmp.ne.s32.totalorder %s953_s25, %s768_s30  ;;  %p770_p1 = pneg %p957_p13 }
  0x16   : > { %s773_s4 = scalar_lea.hbm %s1218_s0, 1024  ;;  %p774_p4 = scmp.lt.u32.totalorder %s953_s25, %s1218_s0 }
  0x17   : > { %p771_p2 = pnand %p770_p1, %p769_p0  ;;  %p775_p5 = scmp.lt.u32.totalorder %s773_s4, %s768_s30 }
  0x18   : > { %p777_p8 = scmp.lt.u32.totalorder %s768_s30, %s953_s25 }
  0x19   : > { %p772_p3 = pneg %p771_p2  ;;  %p776_p7 = por %p775_p5, %p774_p4 }
  0x1b   : > { %p778_p10 = por %p777_p8, %p776_p7 }
  0x1d   : > { %p779_p9 = pnand %p778_p10, %p772_p3 }
  0x1f   : > { %782 = shalt.err (!%p779_p9)
}
  0x20   : > { %s783_s13 = scalar_lea.vmem %s961_s27, 512  ;;  %s866_s14 = smov [#allocation2]  }
  0x21   : > { %p784_p0 = scmp.ne.s32.totalorder %s961_s27, %s783_s13  ;;  %s788_s16 = sshll.u32 %s866_s14, 4  ;;  %s789_s16 = int_to_ptr.vmem [resolvable:$false] %s788_s16 }
  0x22   : > { %s790_s20 = scalar_lea.vmem %s789_s16, 1024  ;;  %p791_p11 = scmp.lt.s32.totalorder %s961_s27, %s789_s16 }
  0x23   : > { %p786_p2 = pnand %p784_p0, %p770_p1  ;;  %p792_p4 = scmp.lt.s32.totalorder %s790_s20, %s783_s13 }
  0x25   : > { %p787_p12 = pneg %p786_p2  ;;  %p793_p5 = por %p792_p4, %p791_p11 }
  0x27   : > { %p794_p7 = pnand %p793_p5, %p787_p12 }
  0x29   : > { %797 = shalt.err (!%p794_p7)
}
  0x2a   : > { %s867_s21 = smov 256   ;;  %s868_s22 = smov 16  }
  0x2b   : > { %717 = dma.hbm_to_vmem [thread:$0]  (!%p957_p13), %s953_s25, 512, %s961_s27, %s963_s29, %s867_s21, %s867_s21, %s868_s22  }
  0x2c   : > { %p684_p9 = scmp.ge.s32.totalorder %s864_s9, 1  ;;  %p106_p1 = scmp.lt.s32.totalorder %s864_s9, 3 }
  0x2e   : > { %p107_p3 = pnand %p684_p9, %p106_p1 }
  0x2f   : > { %s994_s23 = sand.u32 (!%p107_p3), 1, %s856_s7  }
  0x30   : > { %110 = sbr.rel (%p107_p3) target bundleno = 231 (0xe7), region = 24  ;;  %s685_s24 = sshll.u32 (!%p107_p3), %s994_s23, 5 }
  0x31   : > { %s113_s26 = scalar_lea.sflag (!%p107_p3), [#allocation3], %s994_s23  ;;  %s998_s30 = scalar_lea.vmem (!%p107_p3), [#allocation2], %s685_s24 }
  0x37   : > { %843 = dma.done.wait (%p933_p6), %s113_s26, 512  }
  0x38   : > { %845 = vsyncadd (%p933_p6), %s113_s26, 4294966784  ;;  %v135_v0 = vlaneseq  ;;  %v687_v4 = vld [vmem:[%s998_s30 + $0x1] ss:$8 sm:$0x3]  ;;  %s869_s25 = smov 16   ;;  %s870_s17 = smov 17  }
  0x39   : > { %v162_v5 = vld [vmem:[%s998_s30] ss:$8 sm:$0x3]  ;;  %v689_v10 = vld [vmem:[%s998_s30 + $0x2] ss:$8 sm:$0x3] }
  0x3a   : > { %v1004_v1 = vshrl.u32 %v135_v0, 7  ;;  %vm1013_vm0 = vcmp.lt.s32.totalorder %v135_v0, 256  ;;  %v693_v12 = vld [vmem:[%s998_s30 + $0x4] ss:$8 sm:$0x3]  ;;  %s1018_s27 = scalar_lea.vmem [#allocation5], %s685_s24 }
  0x3b   : > { %694 = vst.msk [vmem:[%s1018_s27 + $0x4] ss:$8 sm:$0x3] %vm1013_vm0, %v693_v12  ;;  %v691_v15 = vld [vmem:[%s998_s30 + $0x3] ss:$8 sm:$0x3] }
  0x3c   : > { %v166_v2 = vsub.s32 0, %v1004_v1  ;;  %v170_v3 = vsub.s32 1, %v1004_v1  ;;  %s871_s28 = smov 15   ;;  %v695_v18 = vld [vmem:[%s998_s30 + $0x5] ss:$8 sm:$0x3] }
  0x3d   : > { %s872_s29 = smov 1   ;;  %v697_v21 = vld [vmem:[%s998_s30 + $0x6] ss:$8 sm:$0x3]  ;;  %s873_s2 = smov 127   ;;  %v1034_v34 = vand.u32 127, %v135_v0 }
  0x3e   : > { %v227_v6 = vrot.slane %v687_v4, %v166_v2  ;;  %v167_v7 = vrot.slane %v162_v5, %v166_v2  ;;  %v231_v8 = vrot.slane %v687_v4, %v170_v3  ;;  %v171_v9 = vrot.slane %v162_v5, %v170_v3  ;;  %v699_v24 = vld [vmem:[%s998_s30 + $0x7] ss:$8 sm:$0x3]  ;;  %s874_s3 = smov 113   ;;  %s875_s4 = smov 112  }
  0x3f   : > { %v280_v13 = vrot.slane %v689_v10, %v170_v3  ;;  %v276_v14 = vrot.slane %v689_v10, %v166_v2  ;;  %v327_v16 = vrot.slane %v691_v15, %v170_v3  ;;  %v323_v17 = vrot.slane %v691_v15, %v166_v2  ;;  %v701_v27 = vld [vmem:[%s998_s30 + $0x10] ss:$8 sm:$0x3]  ;;  %v564_v30 = vld [vmem:[%s998_s30 + $0x18] sm:$0xfe]  ;;  %s876_s5 = smov 111  }
  0x40   : > { %234 = vrot.lane.b32.xlu1 %v227_v6, %s869_s25  ;;  %174 = vrot.lane.b32.xlu0 %v167_v7, %s870_s17  ;;  %v383_v19 = vrot.slane %v695_v18, %v170_v3  ;;  %v379_v20 = vrot.slane %v695_v18, %v166_v2  ;;  %v430_v22 = vrot.slane %v697_v21, %v170_v3  ;;  %v563_v31 = vld [vmem:[%s998_s30 + $0x10] sm:$0xfe]  ;;  %v568_v32 = vrot.slane %v564_v30, 1  ;;  %s709_s11 = sshll.u32 %s911_s10, 9  ;;  %s605_s13 = sshll.u32 %s1018_s27, 4  ;;  %s1168_s13 = int_to_ptr.vmem [resolvable:$true] %s605_s13 }
  0x41   : > { %v426_v23 = vrot.slane %v697_v21, %v166_v2  ;;  %v481_v25 = vrot.slane %v699_v24, %v170_v3  ;;  %v477_v26 = vrot.slane %v699_v24, %v166_v2  ;;  %v528_v28 = vrot.slane %v701_v27, %v170_v3  ;;  %s1165_s16 = scalar_lea.hbm %s1219_s1, %s709_s11  ;;  %s592_s20 = scalar_lea.sflag [#allocation4], %s994_s23 }
  0x42   : > { %v524_v29 = vrot.slane %v701_v27, %v166_v2  ;;  %v567_v33 = vrot.slane %v563_v31, 1  ;;  %v1037_v35 = vadd.s32 128, %v1034_v34  ;;  %v877_v36 = vmov 1966171168   ;;  %s798_s21 = scalar_lea.vmem %s1168_s13, 512  ;;  %p1238_p11 = scmp.ne.s32.totalorder %s1223_s18, 0 }
  0x43   : > { %v201_v37 = vunpack.c.l.s4 %v877_v36  ;;  %v142_v38 = vand.u32 15, %v1034_v34  ;;  %vm181_vm1 = vcmp.ge.s32.totalorder %v1034_v34, 16  ;;  %vm238_vm3 = vcmp.lt.s32.totalorder %v1034_v34, 16  ;;  %p799_p6 = scmp.ne.s32.totalorder %s1168_s13, %s798_s21  ;;  %s878_s22 = smov [#allocation5]  }
  0x44   : > { %236 = vrot.lane.b32.xlu1 %v231_v8, %s869_s25  ;;  %176 = vrot.lane.b32.xlu0 %v171_v9, %s870_s17  ;;  %v149_v39 = vand.u32 15, %v1037_v35  ;;  %vm178_vm4 = vcmp.lt.s32.totalorder %v1034_v34, 17  ;;  %vm287_vm8 = vcmp.lt.s32.totalorder %v1034_v34, 15  ;;  %vm334_vm11 = vcmp.lt.s32.totalorder %v1034_v34, 1  ;;  %s802_s24 = sshll.u32 %s878_s22, 4  ;;  %s803_s24 = int_to_ptr.vmem [resolvable:$false] %s802_s24 }
  0x45   : > { %v202_v40 = vunpack.c.0.s8 %v201_v37  ;;  %vm1042_vm2 = vcmp.ge.s32.totalorder %v142_v38, 1  ;;  %vm1063_vm7 = vcmp.lt.s32.totalorder %v142_v38, 15  ;;  %vm390_vm12 = vcmp.lt.s32.totalorder %v1034_v34, 127  ;;  %p800_p12 = pnand %p799_p6, %p1238_p11  ;;  %s804_s26 = scalar_lea.vmem %s803_s24, 1024 }
  0x46   : > { %vm1048_vm5 = vcmp.ge.s32.totalorder %v149_v39, 1  ;;  %vm1056_vm6 = vmand %vm181_vm1, %vm1042_vm2  ;;  %vm1078_vm9 = vcmp.lt.s32.totalorder %v149_v39, 15  ;;  %vm441_vm13 = vcmp.lt.s32.totalorder %v1037_v35, 240  ;;  %vm437_vm14 = vcmp.lt.s32.totalorder %v1034_v34, 113  ;;  %p805_p8 = scmp.lt.s32.totalorder %s1168_s13, %s803_s24  ;;  %p806_p10 = scmp.lt.s32.totalorder %s804_s26, %s798_s21 }
  0x47   : > { %v1061_v46 = vsub.s32 %v202_v40, %v1004_v1  ;;  %vm292_vm10 = vmand %vm181_vm1, %vm1063_vm7  ;;  %p801_p13 = pneg %p800_p12 }
  0x48   : > { %285 = vrot.lane.b32.xlu1 %v280_v13, %s871_s28  ;;  %283 = vrot.lane.b32.xlu0 %v276_v14, %s871_s28  ;;  %vm445_vm15 = vmand %vm441_vm13, %vm1048_vm5  ;;  %p807_p0 = por %p806_p10, %p805_p8 }
  0x4a   : > { %p808_p2 = pnand %p807_p0, %p801_p13 }
  0x4c   : > { %332 = vrot.lane.b32.xlu1 %v327_v16, %s872_s29  ;;  %330 = vrot.lane.b32.xlu0 %v323_v17, %s872_s29 }
  0x50   : > { %388 = vrot.lane.b32.xlu1 %v383_v19, %s873_s2  ;;  %386 = vrot.lane.b32.xlu0 %v379_v20, %s873_s2 }
  0x54   : > { %435 = vrot.lane.b32.xlu1 %v430_v22, %s874_s3  ;;  %433 = vrot.lane.b32.xlu0 %v426_v23, %s874_s3 }
  0x58   : > { %486 = vrot.lane.b32.xlu1 %v481_v25, %s875_s4  ;;  %484 = vrot.lane.b32.xlu0 %v477_v26, %s875_s4 }
  0x5c   : > { %533 = vrot.lane.b32.xlu1 %v528_v28, %s876_s5  ;;  %531 = vrot.lane.b32.xlu0 %v524_v29, %s876_s5 }
  0x60   : > { %573 = vrot.lane.b32.xlu1 %v568_v32, %s870_s17  ;;  %571 = vrot.lane.b32.xlu0 %v567_v33, %s870_s17 }
  0xb2   : > { %v235_v41 = vpop.permute.xlu1 %234  ;;  %v175_v42 = vpop.permute.xlu0 %174 }
  0xb6   : > { %v237_v47 = vpop.permute.xlu1 %236  ;;  %v177_v48 = vpop.permute.xlu0 %176 }
  0xb7   : > { %v239_v50 = vsel %vm238_vm3, %v235_v41, %v237_v47  ;;  %v240_v51 = vsel %vm238_vm3, %v237_v47, %v235_v41  ;;  %v179_v52 = vsel %vm178_vm4, %v175_v42, %v177_v48  ;;  %v180_v53 = vsel %vm178_vm4, %v177_v48, %v175_v42  ;;  %vm539_vm3 = vmand %vm441_vm13, %vm1078_vm9 }
  0xb8   : > { %v247_v54 = vsel %vm181_vm1, %v240_v51, 0.0  ;;  %v195_v55 = vsel %vm1056_vm6, %v180_v53, 0.0  ;;  %v196_v56 = vsel %vm1048_vm5, %v179_v52, 0.0  ;;  %vm488_vm1 = vcmp.lt.s32.totalorder %v1034_v34, 112 }
  0xb9   : > { %v251_v57 = vcombine.low %v247_v54, %v239_v50  ;;  %v199_v58 = vcombine.low %v195_v55, %v196_v56 }
  0xba   : > { %v286_v60 = vpop.permute.xlu1 %285  ;;  %v284_v61 = vpop.permute.xlu0 %283 }
  0xbb   : > { %v258_v62 = vrot.slane %v251_v57, %v1061_v46  ;;  %v206_v63 = vrot.slane %v199_v58, %v1061_v46  ;;  %v288_v0 = vsel %vm287_vm8, %v284_v61, %v286_v60  ;;  %v289_v1 = vsel %vm287_vm8, %v286_v60, %v284_v61 }
  0xbc   : > { %v294_v2 = vsel %vm292_vm10, %v289_v1, 0.0  ;;  %v295_v3 = vsel %vm1078_vm9, %v288_v0, 0.0 }
  0xbd   : > { %v265_v4 = vrot.slane %v258_v62, %v1061_v46  ;;  %v213_v5 = vrot.slane %v206_v63, %v1061_v46  ;;  %v298_v6 = vcombine.low %v294_v2, %v295_v3 }
  0xbe   : > { %v333_v7 = vpop.permute.xlu1 %332  ;;  %v331_v8 = vpop.permute.xlu0 %330 }
  0xbf   : > { %688 = vst.msk [vmem:[%s1018_s27 + $0x1] ss:$8 sm:$0x3] %vm1013_vm0, %v265_v4  ;;  %219 = vst.msk [vmem:[%s1018_s27] ss:$8 sm:$0x3] %vm1013_vm0, %v213_v5  ;;  %v305_v9 = vrot.slane %v298_v6, %v1061_v46  ;;  %v335_v10 = vsel %vm334_vm11, %v331_v8, %v333_v7  ;;  %v336_v12 = vsel %vm334_vm11, %v333_v7, %v331_v8 }
  0xc0   : > { %v345_v13 = vsel %vm1042_vm2, %v336_v12, 0.0  ;;  %v346_v14 = vsel %vm1048_vm5, %v335_v10, 0.0 }
  0xc1   : > { %v312_v15 = vrot.slane %v305_v9, %v1061_v46  ;;  %v349_v16 = vcombine.low %v345_v13, %v346_v14 }
  0xc2   : > { %v389_v17 = vpop.permute.xlu1 %388  ;;  %v387_v18 = vpop.permute.xlu0 %386 }
  0xc3   : > { %690 = vst.msk [vmem:[%s1018_s27 + $0x2] ss:$8 sm:$0x3] %vm1013_vm0, %v312_v15  ;;  %v356_v19 = vrot.slane %v349_v16, %v1061_v46  ;;  %v391_v20 = vsel %vm390_vm12, %v387_v18, %v389_v17  ;;  %v392_v21 = vsel %vm390_vm12, %v389_v17, %v387_v18 }
  0xc4   : > { %v397_v22 = vsel %vm1063_vm7, %v391_v20, 0.0  ;;  %v398_v23 = vsel %vm1078_vm9, %v392_v21, 0.0 }
  0xc5   : > { %v363_v24 = vrot.slane %v356_v19, %v1061_v46  ;;  %v401_v25 = vcombine.low %v397_v22, %v398_v23 }
  0xc6   : > { %v436_v26 = vpop.permute.xlu1 %435  ;;  %v434_v27 = vpop.permute.xlu0 %433 }
  0xc7   : > { %692 = vst.msk [vmem:[%s1018_s27 + $0x3] ss:$8 sm:$0x3] %vm1013_vm0, %v363_v24  ;;  %v408_v28 = vrot.slane %v401_v25, %v1061_v46  ;;  %v438_v29 = vsel %vm437_vm14, %v434_v27, %v436_v26  ;;  %v439_v30 = vsel %vm437_vm14, %v436_v26, %v434_v27 }
  0xc8   : > { %v448_v31 = vsel %vm1042_vm2, %v438_v29, 0.0  ;;  %v449_v32 = vsel %vm445_vm15, %v439_v30, 0.0  ;;  %vm535_vm2 = vcmp.lt.s32.totalorder %v1034_v34, 111 }
  0xc9   : > { %v415_v33 = vrot.slane %v408_v28, %v1061_v46  ;;  %v452_v36 = vcombine.low %v448_v31, %v449_v32 }
  0xca   : > { %v487_v37 = vpop.permute.xlu1 %486  ;;  %v485_v38 = vpop.permute.xlu0 %484 }
  0xcb   : > { %696 = vst.msk [vmem:[%s1018_s27 + $0x5] ss:$8 sm:$0x3] %vm1013_vm0, %v415_v33  ;;  %v459_v39 = vrot.slane %v452_v36, %v1061_v46  ;;  %v489_v40 = vsel %vm488_vm1, %v485_v38, %v487_v37  ;;  %v490_v41 = vsel %vm488_vm1, %v487_v37, %v485_v38 }
  0xcc   : > { %v496_v42 = vsel %vm441_vm13, %v490_v41, 0.0 }
  0xcd   : > { %v466_v43 = vrot.slane %v459_v39, %v1061_v46  ;;  %v499_v47 = vcombine.low %v489_v40, %v496_v42 }
  0xce   : > { %v534_v48 = vpop.permute.xlu1 %533  ;;  %v532_v50 = vpop.permute.xlu0 %531 }
  0xcf   : > { %698 = vst.msk [vmem:[%s1018_s27 + $0x6] ss:$8 sm:$0x3] %vm1013_vm0, %v466_v43  ;;  %v506_v51 = vrot.slane %v499_v47, %v1061_v46  ;;  %v536_v52 = vsel %vm535_vm2, %v532_v50, %v534_v48  ;;  %v537_v53 = vsel %vm535_vm2, %v534_v48, %v532_v50 }
  0xd0   : > { %v540_v54 = vsel %vm1063_vm7, %v536_v52, 0.0  ;;  %v541_v55 = vsel %vm539_vm3, %v537_v53, 0.0 }
  0xd1   : > { %v513_v56 = vrot.slane %v506_v51, %v1061_v46  ;;  %v544_v57 = vcombine.low %v540_v54, %v541_v55 }
  0xd2   : > { %v574_v35 = vpop.permute.xlu1 %573  ;;  %v572_v58 = vpop.permute.xlu0 %571 }
  0xd3   : > { %700 = vst.msk [vmem:[%s1018_s27 + $0x7] ss:$8 sm:$0x3] %vm1013_vm0, %v513_v56  ;;  %v551_v59 = vrot.slane %v544_v57, %v1061_v46  ;;  %v575_v49 = vsel %vm178_vm4, %v572_v58, %v574_v35  ;;  %v576_v60 = vsel %vm178_vm4, %v574_v35, %v572_v58 }
  0xd4   : > { %v581_v61 = vsel %vm1056_vm6, %v576_v60, 0.0  ;;  %v582_v62 = vsel %vm1048_vm5, %v575_v49, 0.0 }
  0xd5   : > { %v558_v63 = vrot.slane %v551_v59, %v1061_v46  ;;  %v585_v0 = vrot.slane %v581_v61, 7  ;;  %v586_v1 = vrot.slane %v582_v62, 7 }
  0xd7   : > { %702 = vst.msk [vmem:[%s1018_s27 + $0x10] ss:$8 sm:$0x3] %vm1013_vm0, %v558_v63  ;;  %589 = vst [vmem:[%s1018_s27 + $0x10] sm:$0xfe] %v585_v0 }
  0xd8   : > { %590 = vst [vmem:[%s1018_s27 + $0x18] sm:$0xfe] %v586_v1 }
  0xd9   : > { %811 = shalt.err (!%p808_p2)
}
  0xda   : > { %s812_s30 = scalar_lea.hbm %s1165_s16, 512  ;;  %s816_s28 = scalar_lea.hbm %s1219_s1, 1024 }
  0xdb   : > { %p813_p4 = scmp.ne.s32.totalorder %s1165_s16, %s812_s30  ;;  %p817_p9 = scmp.lt.u32.totalorder %s1165_s16, %s1219_s1 }
  0xdc   : > { %p818_p1 = scmp.lt.u32.totalorder %s816_s28, %s812_s30  ;;  %p820_p6 = scmp.lt.u32.totalorder %s812_s30, %s1165_s16 }
  0xdd   : > { %p814_p5 = pnand %p813_p4, %p1238_p11 }
  0xde   : > { %p819_p3 = por %p818_p1, %p817_p9 }
  0xdf   : > { %p815_p7 = pneg %p814_p5 }
  0xe0   : > { %p821_p12 = por %p820_p6, %p819_p3 }
  0xe2   : > { %p822_p13 = pnand %p821_p12, %p815_p7 }
  0xe4   : > { %825 = shalt.err (!%p822_p13)
}
  0xe5   : > { %s879_s3 = smov 256  }
  0xe6   : > { %712 = dma.vmem_to_hbm [thread:$0]  (%p1238_p11), %s1168_s13, 512, %s1165_s16, %s592_s20, %s879_s3, %s879_s3, %s869_s25  }
  0xe7 PF: > { %s620_s4 = sand.u32 1, %s852_s6   ;;  %p1239_p8 = scmp.ne.s32.totalorder %s1224_s19, 0 }
  0xe8   : > { %p1240_p10 = scmp.ge.s32.totalorder %s864_s9, 2  ;;  %s621_s5 = scalar_lea.sflag [#allocation4], %s620_s4 }
  0xea   : > { %p719_p0 = pnand %p1240_p10, %p1239_p8 }
  0xec   : > { %847 = dma.done.wait (!%p719_p0), %s621_s5, 512  }
  0xed   : > { %849 = vsyncadd (!%p719_p0), %s621_s5, 4294966784  ;;  %p14_p2 = scmp.ge.s32.totalorder %s915_s12, 4   ;;  %s1241_s6 = smov %s856_s7 }
  0xee   : > { %s1242_s7 = smov %s860_s8  ;;  %s1243_s8 = smov %s927_s15 }
  0xef   : > { %s1244_s9 = smov %s915_s12  ;;  %16 = sbr.rel (!%p14_p2) target bundleno = 5 (0x5), region = 85 }
  0xf6   :  { %626 = vsyncpa [#allocation3], 1 }
  0xf7   :  { %628 = vsyncpa [#allocation3 + $0x1], 1 }
  0xf8   :  { %629 = vsyncpa [#allocation4], 1 }
  0xf9   :  { %631 = vsyncpa [#allocation4 + $0x1], 1 }

</bundles_post_ra>
